<compile_context>
chip_gen: v7x
topology: tpu7x:2x2x1
jax: 0.10.0
libtpu: 0.0.40
codegen_flags: <defaults>
</compile_context>

<pallas_src>
import jax
import jax.numpy as jnp
from jax.experimental import pallas as pl
from jax.experimental.pallas import tpu as pltpu

FLOAT_MAX = float(jnp.finfo(jnp.float32).max)

_LANE = 128
_SUBLANE = 8
_VMEM_BUDGET = 24 << 20      # conservative per-tile footprint budget (all gens)
_VMEM_LIMIT = 32 << 20       # scoped VMEM limit handed to Mosaic


def _round_up(x, m):
    return ((x + m - 1) // m) * m


def _make_kernel(matmul_dtype):
    """Kernel closure; matmul_dtype lets the MXU run bf16 while accumulating f32."""

    def kernel(obs_ref, mask_ref,
               w1_ref, b1_ref,
               w2_ref, b2_ref,
               w3_ref, b3_ref,
               out_ref):
        x = obs_ref[...].astype(matmul_dtype)
        # hidden layer 1: tanh(obs @ W1 + b1)   (bias/tanh in f32)
        h = jnp.tanh(
            jnp.dot(x, w1_ref[...].astype(matmul_dtype),
                    preferred_element_type=jnp.float32) + b1_ref[...]
        )
        # hidden layer 2: tanh(h @ W2 + b2)
        h = jnp.tanh(
            jnp.dot(h.astype(matmul_dtype), w2_ref[...].astype(matmul_dtype),
                    preferred_element_type=jnp.float32) + b2_ref[...]
        )
        # logits layer (compact n_actions lanes; no padding)
        logits = (
            jnp.dot(h.astype(matmul_dtype), w3_ref[...].astype(matmul_dtype),
                    preferred_element_type=jnp.float32) + b3_ref[...]
        )
        # Action masking.  For a binary {0,1} mask this equals
        # clamp(log(mask), -1e10, FLOAT_MAX): log(1)=0, clip(log(0))=-1e10.
        # Pure VPU select: no EUP transcendental, no -inf/NaN intermediates.
        inf_mask = jnp.where(mask_ref[...] > 0.0, 0.0, -1.0e10)
        out_ref[...] = logits + inf_mask

    return kernel


def _choose_tile(B, obs_len, H, n_actions, block_batch):
    """Pick a batch tile: big enough to amortize per-step overhead, small enough
    to fit the cross-gen VMEM budget, and splittable across 2 TCs (v7x)."""
    tb = min(block_batch, _round_up(B, _SUBLANE))
    # Ensure >=2 grid tiles when the batch is big enough, so ("parallel",)
    # dimension semantics can actually use both v7x TensorCores.
    if B >= 2 * _SUBLANE:
        tb = min(tb, _round_up(pl.cdiv(B, 2), _SUBLANE))
    tb = max(_SUBLANE, _round_up(tb, _SUBLANE))

    def footprint(t):
        # double-buffered activation tiles (obs + mask + out), resident weights,
        # and f32 intermediates (h1, h2, logits) the compiler keeps live.
        act = 2 * 4 * t * (obs_len + 2 * n_actions)
        wts = 4 * (obs_len * H + H * H + H * n_actions + 2 * H + n_actions)
        tmp = 4 * t * (2 * H + n_actions)
        return act + wts + tmp

    while tb > _SUBLANE and footprint(tb) > _VMEM_BUDGET:
        tb = max(_SUBLANE, _round_up(tb // 2, _SUBLANE))
    return tb


def masked_actions_forward(observation, action_mask, params, *,
                           block_batch=2048, matmul_dtype=jnp.float32):
    """observation: (B, obs_len) f32; action_mask: (B, n_actions) f32, BINARY {0,1}.

    Contract: the mask must be binary (as produced by the Leduc env); fractional
    mask values would differ from the reference clamp(log(mask)) semantics.
    """
    w1, b1, w2, b2, w3, b3 = params
    B, obs_len = observation.shape
    n_actions = action_mask.shape[1]
    H = w1.shape[1]

    tb = _choose_tile(B, obs_len, H, n_actions, block_batch)
    Bp = _round_up(B, tb)
    if Bp != B:
        obs_p = jnp.zeros((Bp, obs_len), observation.dtype).at[:B].set(observation)
        mask_p = jnp.zeros((Bp, n_actions), action_mask.dtype).at[:B].set(action_mask)
    else:
        obs_p, mask_p = observation, action_mask

    grid = (Bp // tb,)

    def batch_spec(width):
        return pl.BlockSpec((tb, width), lambda i: (i, 0))

    def resident_spec(shape):
        # Constant index_map: weights/biases are DMA'd once and stay VMEM-resident.
        # TODO(synk): pipeline_mode=pl.Buffered(1) would drop the redundant second
        # weight buffer (pure VMEM saving); omitted to stay conservative.
        return pl.BlockSpec(shape, lambda i: (0, 0))

    cost = pl.CostEstimate(
        flops=2 * Bp * (obs_len * H + H * H + H * n_actions),
        transcendentals=2 * Bp * H,
        bytes_accessed=4 * (Bp * (obs_len + 2 * n_actions)
                            + obs_len * H + H * H + H * n_actions
                            + 2 * H + n_actions),
    )

    out = pl.pallas_call(
        _make_kernel(matmul_dtype),
        out_shape=jax.ShapeDtypeStruct((Bp, n_actions), jnp.float32),
        grid=grid,
        in_specs=[
            batch_spec(obs_len),               # observation tile
            batch_spec(n_actions),             # compact action-mask tile
            resident_spec((obs_len, H)),       # W1
            resident_spec((1, H)),             # b1
            resident_spec((H, H)),             # W2
            resident_spec((1, H)),             # b2
            resident_spec((H, n_actions)),     # W3 (compact, no lane padding)
            resident_spec((1, n_actions)),     # b3 (compact)
        ],
        out_specs=batch_spec(n_actions),       # compact output -> no trailing lane slice
        compiler_params=pltpu.CompilerParams(
            dimension_semantics=("parallel",),
            vmem_limit_bytes=_VMEM_LIMIT),
        cost_estimate=cost,
    )(obs_p, mask_p, w1, b1, w2, b2, w3, b3)

    return out if Bp == B else out[:B]


def init_params(key, obs_len, hidden, n_actions):
    """Deterministic synthetic init (shapes match TorchFC with fcnet_hiddens=[H,H])."""
    ks = jax.random.split(key, 6)

    def lin(kw, kb, fan_in, fan_out):
        scale = 1.0 / jnp.sqrt(jnp.float32(fan_in))
        w = jax.random.uniform(kw, (fan_in, fan_out), jnp.float32, -scale, scale)
        b = jax.random.uniform(kb, (1, fan_out), jnp.float32, -scale, scale)
        return w, b

    w1, b1 = lin(ks[0], ks[1], obs_len, hidden)
    w2, b2 = lin(ks[2], ks[3], hidden, hidden)
    w3, b3 = lin(ks[4], ks[5], hidden, n_actions)
    return (w1, b1, w2, b2, w3, b3)


def reference_forward(observation, action_mask, params):
    """Pure-JAX reference with the original log+clip masking semantics."""
    w1, b1, w2, b2, w3, b3 = params
    h = jnp.tanh(observation @ w1 + b1)
    h = jnp.tanh(h @ w2 + b2)
    logits = h @ w3 + b3
    inf_mask = jnp.clip(jnp.log(action_mask), -1.0e10, FLOAT_MAX)
    return logits + inf_mask


def _make_inputs(key, batch, obs_len, n_actions):
    k_obs, k_mask = jax.random.split(key)
    observation = jax.random.normal(k_obs, (batch, obs_len), jnp.float32)
    action_mask = (jax.random.uniform(k_mask, (batch, n_actions)) > 0.5).astype(jnp.float32)
    action_mask = action_mask.at[:, 0].set(1.0)   # at least one legal action per row
    return observation, action_mask


if __name__ == "__main__":
    # Leduc-like sizes: full obs = obs_len + n_actions; here obs_len=32, n_actions=4.
    obs_len, hidden, n_actions = 32, 64, 4

    key = jax.random.PRNGKey(0)
    k_small, k_big, k_param = jax.random.split(key, 3)
    params = init_params(k_param, obs_len, hidden, n_actions)

    # Case 1: small batch (single tile).
    obs, mask = _make_inputs(k_small, 8, obs_len, n_actions)
    out = jax.block_until_ready(masked_actions_forward(obs, mask, params))
    ref = reference_forward(obs, mask, params)
    assert out.shape == (8, n_actions)
    assert jnp.allclose(out, ref, atol=1e-4, rtol=1e-4), "mismatch vs reference (B=8)"

    # Case 2: batch not a multiple of the tile -> exercises batch padding + 2-tile grid.
    obs2, mask2 = _make_inputs(k_big, 50, obs_len, n_actions)
    out2 = jax.block_until_ready(masked_actions_forward(obs2, mask2, params))
    ref2 = reference_forward(obs2, mask2, params)
    assert out2.shape == (50, n_actions)
    assert jnp.allclose(out2, ref2, atol=1e-4, rtol=1e-4), "mismatch vs reference (B=50)"

    print("KERNEL_OK")
</pallas_src>

<mosaic_0001>
module attributes {stable_mosaic.version = 11 : i64} {
  func.func @kernel(%arg0: i32, %arg1: memref<8x32xf32, #tpu.memory_space<vmem>>, %arg2: memref<8x4xf32, #tpu.memory_space<vmem>>, %arg3: memref<32x64xf32, #tpu.memory_space<vmem>>, %arg4: memref<1x64xf32, #tpu.memory_space<vmem>>, %arg5: memref<64x64xf32, #tpu.memory_space<vmem>>, %arg6: memref<1x64xf32, #tpu.memory_space<vmem>>, %arg7: memref<64x4xf32, #tpu.memory_space<vmem>>, %arg8: memref<1x4xf32, #tpu.memory_space<vmem>>, %arg9: memref<8x4xf32, #tpu.memory_space<vmem>>) attributes {dimension_semantics = [#tpu.dimension_semantics<parallel>], iteration_bounds = array<i64: 1>, scalar_prefetch = 0 : i64, scratch_operands = 0 : i64, tpu.core_type = #tpu.core_type<tc>, window_params = [{transform_indices = @transform_0, window_bounds = array<i64: 8, 32>}, {transform_indices = @transform_1, window_bounds = array<i64: 8, 4>}, {pipeline_mode = #tpu.pipeline_mode<synchronous>, transform_indices = @transform_2, window_bounds = array<i64: 32, 64>}, {pipeline_mode = #tpu.pipeline_mode<synchronous>, transform_indices = @transform_3, window_bounds = array<i64: 1, 64>}, {pipeline_mode = #tpu.pipeline_mode<synchronous>, transform_indices = @transform_4, window_bounds = array<i64: 64, 64>}, {pipeline_mode = #tpu.pipeline_mode<synchronous>, transform_indices = @transform_5, window_bounds = array<i64: 1, 64>}, {pipeline_mode = #tpu.pipeline_mode<synchronous>, transform_indices = @transform_6, window_bounds = array<i64: 64, 4>}, {pipeline_mode = #tpu.pipeline_mode<synchronous>, transform_indices = @transform_7, window_bounds = array<i64: 1, 4>}, {transform_indices = @transform_8, window_bounds = array<i64: 8, 4>}]} {
    %c0 = arith.constant 0 : index
    %c0_0 = arith.constant 0 : index
    %0 = vector.load %arg1[%c0, %c0_0] : memref<8x32xf32, #tpu.memory_space<vmem>>, vector<8x32xf32>
    %c0_1 = arith.constant 0 : index
    %c0_2 = arith.constant 0 : index
    %1 = vector.load %arg3[%c0_1, %c0_2] : memref<32x64xf32, #tpu.memory_space<vmem>>, vector<32x64xf32>
    %cst = arith.constant dense<0.000000e+00> : vector<8x64xf32>
    %2 = tpu.matmul %0, %1, %cst {dimension_numbers = #tpu.dot_dimension_numbers<[1], [0], [0], [1], [0, 0, 1, 1], [], []>} : vector<8x32xf32>, vector<32x64xf32>, vector<8x64xf32> -> vector<8x64xf32>
    %c0_3 = arith.constant 0 : index
    %c0_4 = arith.constant 0 : index
    %3 = vector.load %arg4[%c0_3, %c0_4] : memref<1x64xf32, #tpu.memory_space<vmem>>, vector<1x64xf32>
    %4 = vector.broadcast %3 : vector<1x64xf32> to vector<8x64xf32>
    %5 = arith.addf %2, %4 : vector<8x64xf32>
    %6 = math.tanh %5 : vector<8x64xf32>
    %c0_5 = arith.constant 0 : index
    %c0_6 = arith.constant 0 : index
    %7 = vector.load %arg5[%c0_5, %c0_6] : memref<64x64xf32, #tpu.memory_space<vmem>>, vector<64x64xf32>
    %cst_7 = arith.constant dense<0.000000e+00> : vector<8x64xf32>
    %8 = tpu.matmul %6, %7, %cst_7 {dimension_numbers = #tpu.dot_dimension_numbers<[1], [0], [0], [1], [0, 0, 1, 1], [], []>} : vector<8x64xf32>, vector<64x64xf32>, vector<8x64xf32> -> vector<8x64xf32>
    %c0_8 = arith.constant 0 : index
    %c0_9 = arith.constant 0 : index
    %9 = vector.load %arg6[%c0_8, %c0_9] : memref<1x64xf32, #tpu.memory_space<vmem>>, vector<1x64xf32>
    %10 = vector.broadcast %9 : vector<1x64xf32> to vector<8x64xf32>
    %11 = arith.addf %8, %10 : vector<8x64xf32>
    %12 = math.tanh %11 : vector<8x64xf32>
    %c0_10 = arith.constant 0 : index
    %c0_11 = arith.constant 0 : index
    %13 = vector.load %arg7[%c0_10, %c0_11] : memref<64x4xf32, #tpu.memory_space<vmem>>, vector<64x4xf32>
    %cst_12 = arith.constant dense<0.000000e+00> : vector<8x4xf32>
    %14 = tpu.matmul %12, %13, %cst_12 {dimension_numbers = #tpu.dot_dimension_numbers<[1], [0], [0], [1], [0, 0, 1, 1], [], []>} : vector<8x64xf32>, vector<64x4xf32>, vector<8x4xf32> -> vector<8x4xf32>
    %c0_13 = arith.constant 0 : index
    %c0_14 = arith.constant 0 : index
    %15 = vector.load %arg8[%c0_13, %c0_14] : memref<1x4xf32, #tpu.memory_space<vmem>>, vector<1x4xf32>
    %16 = vector.broadcast %15 : vector<1x4xf32> to vector<8x4xf32>
    %17 = arith.addf %14, %16 : vector<8x4xf32>
    %c0_15 = arith.constant 0 : index
    %c0_16 = arith.constant 0 : index
    %18 = vector.load %arg2[%c0_15, %c0_16] : memref<8x4xf32, #tpu.memory_space<vmem>>, vector<8x4xf32>
    %cst_17 = arith.constant 0.000000e+00 : f32
    %19 = vector.broadcast %cst_17 : f32 to vector<8x4xf32>
    %20 = arith.cmpf ogt, %18, %19 : vector<8x4xf32>
    %cst_18 = arith.constant 0.000000e+00 : f32
    %cst_19 = arith.constant -1.000000e+10 : f32
    %21 = vector.broadcast %cst_18 : f32 to vector<8x4xf32>
    %22 = vector.broadcast %cst_19 : f32 to vector<8x4xf32>
    %23 = arith.select %20, %21, %22 : vector<8x4xi1>, vector<8x4xf32>
    %24 = arith.addf %17, %23 : vector<8x4xf32>
    %c0_20 = arith.constant 0 : index
    %c0_21 = arith.constant 0 : index
    %25 = vector.load %arg9[%c0_20, %c0_21] : memref<8x4xf32, #tpu.memory_space<vmem>>, vector<8x4xf32>
    tpu.vector_store %arg9[%c0_20, %c0_21], %24 {strides = array<i32>} : memref<8x4xf32, #tpu.memory_space<vmem>>, vector<8x4xf32>,
    return
  }
  func.func @transform_0(%arg0: i32) -> (i32, i32) {
    %c0_i32 = arith.constant 0 : i32
    %c0_i32_0 = arith.constant 0 : i32
    return %arg0, %c0_i32 : i32, i32
  }
  func.func @transform_1(%arg0: i32) -> (i32, i32) {
    %c0_i32 = arith.constant 0 : i32
    %c0_i32_0 = arith.constant 0 : i32
    return %arg0, %c0_i32 : i32, i32
  }
  func.func @transform_2(%arg0: i32) -> (i32, i32) {
    %c0_i32 = arith.constant 0 : i32
    %c0_i32_0 = arith.constant 0 : i32
    %c0_i32_1 = arith.constant 0 : i32
    return %c0_i32, %c0_i32_0 : i32, i32
  }
  func.func @transform_3(%arg0: i32) -> (i32, i32) {
    %c0_i32 = arith.constant 0 : i32
    %c0_i32_0 = arith.constant 0 : i32
    %c0_i32_1 = arith.constant 0 : i32
    return %c0_i32, %c0_i32_0 : i32, i32
  }
  func.func @transform_4(%arg0: i32) -> (i32, i32) {
    %c0_i32 = arith.constant 0 : i32
    %c0_i32_0 = arith.constant 0 : i32
    %c0_i32_1 = arith.constant 0 : i32
    return %c0_i32, %c0_i32_0 : i32, i32
  }
  func.func @transform_5(%arg0: i32) -> (i32, i32) {
    %c0_i32 = arith.constant 0 : i32
    %c0_i32_0 = arith.constant 0 : i32
    %c0_i32_1 = arith.constant 0 : i32
    return %c0_i32, %c0_i32_0 : i32, i32
  }
  func.func @transform_6(%arg0: i32) -> (i32, i32) {
    %c0_i32 = arith.constant 0 : i32
    %c0_i32_0 = arith.constant 0 : i32
    %c0_i32_1 = arith.constant 0 : i32
    return %c0_i32, %c0_i32_0 : i32, i32
  }
  func.func @transform_7(%arg0: i32) -> (i32, i32) {
    %c0_i32 = arith.constant 0 : i32
    %c0_i32_0 = arith.constant 0 : i32
    %c0_i32_1 = arith.constant 0 : i32
    return %c0_i32, %c0_i32_0 : i32, i32
  }
  func.func @transform_8(%arg0: i32) -> (i32, i32) {
    %c0_i32 = arith.constant 0 : i32
    %c0_i32_0 = arith.constant 0 : i32
    return %arg0, %c0_i32 : i32, i32
  }
}

</mosaic_0001>

<bundles_post_ra>
// kernel: tpu_custom_call.1
= control target key start
LH: loop header
LB: loop body
LE: loop exit
PB: predicated region body
PF: predicated region fallthrough
CT: control target
= control target key end

     0   :  { %13 = vsyncpa [#allocation3], 0  ;;  %s462_s27 = smov [#allocation2]   ;;  %s607_s0 = inlined_call_operand.vmem [shape: f32[8,32], index: 0, kind: input, shape index: {}]   ;;  %s608_s1 = inlined_call_operand.vmem [shape: f32[8,4], index: 1, kind: input, shape index: {}]   ;;  %s609_s2 = inlined_call_operand.hbm [shape: f32[32,64], index: 2, kind: input, shape index: {}]   ;;  %s610_s3 = inlined_call_operand.vmem [shape: f32[1,64], index: 3, kind: input, shape index: {}]   ;;  %s611_s4 = inlined_call_operand.vmem [shape: f32[64,64], index: 4, kind: input, shape index: {}]   ;;  %s612_s5 = inlined_call_operand.vmem [shape: f32[1,64], index: 5, kind: input, shape index: {}]   ;;  %s613_s6 = inlined_call_operand.vmem [shape: f32[64,4], index: 6, kind: input, shape index: {}]   ;;  %s614_s7 = inlined_call_operand.vmem [shape: f32[1,4], index: 7, kind: input, shape index: {}]   ;;  %s615_s8 = inlined_call_operand.vmem [shape: f32[8,4], index: 8, kind: output, shape index: {}]  }
   0x1   :  { %s23_s28 = sshll.u32 %s462_s27, 4  ;;  %s438_s9 = scalar_lea.hbm %s609_s2, 512  ;;  %s24_s28 = int_to_ptr.vmem [resolvable:$true] %s23_s28 }
   0x2   :  { %p439_p0 = scmp.ne.s32.totalorder %s609_s2, %s438_s9  ;;  %p442_p1 = scmp.lt.u32.totalorder %s438_s9, %s609_s2 }
   0x4   :  { %p444_p2 = pnand %p442_p1, %p439_p0 }
   0x6   :  { %447 = shalt.err (!%p444_p2)
}
   0x7   :  { %s448_s14 = scalar_lea.vmem %s24_s28, 512  ;;  %p453_p4 = scmp.lt.s32.totalorder %s24_s28, %s24_s28 }
   0x8   :  { %p449_p3 = scmp.ne.s32.totalorder %s24_s28, %s448_s14  ;;  %p454_p5 = scmp.lt.s32.totalorder %s448_s14, %s448_s14 }
   0xa   :  { %p455_p6 = por %p454_p5, %p453_p4 }
   0xc   :  { %p456_p7 = pnand %p455_p6, %p449_p3 }
   0xe   :  { %459 = shalt.err (!%p456_p7)
}
   0xf   :  { %s463_s15 = smov 128   ;;  %s464_s16 = smov 8  }
  0x10   :  { %29 = dma.hbm_to_vmem [thread:$0]  %s609_s2, 512, %s24_s28, [#allocation3], %s463_s15, %s463_s15, %s464_s16  }
  0x11   :  { %460 = dma.done.wait [#allocation3], 512  }
  0x12   :  { %461 = vsyncadd [#allocation3], 4294966784  ;;  %v465_v0 = vmov 0.0|0.0   ;;  %vm466_vm0 = vmmov 0   ;;  %v467_v1 = vmov 0.0   ;;  %v44_v2 = vld [vmem:[#allocation2] sm:$0xff] }
  0x13   :  { %397 = vmatprep.subr.bf16.mxu0 %v465_v0  ;;  %356 = vmatprep.mubr.msk.f32.mxu0 %vm466_vm0, %v467_v1  ;;  %v45_v3 = vld [vmem:[#allocation2 + $0x8] sm:$0xff]  ;;  %v46_v4 = vld [vmem:[#allocation2 + $0x10] sm:$0xff]  ;;  %v47_v6 = vld [vmem:[#allocation2 + $0x18] sm:$0xff]  ;;  %vm55_vm1 = vcmask 261120   ;;  %vm145_vm2 = vcmask 523264   ;;  %vm312_vm4 = vcmask 31744  }
  0x14   :  { %403 = vmatprep.subr.bf16.mxu1 %v465_v0  ;;  %375 = vmatprep.mubr.msk.f32.mxu1 %vm466_vm0, %v467_v1  ;;  %v398_v5 = vpack.c.bf16 %v45_v3, %v44_v2  ;;  %v130_v7 = vld [vmem:[%s611_s4] sm:$0xff]  ;;  %v131_v8 = vld [vmem:[%s611_s4 + $0x8] sm:$0xff]  ;;  %v401_v9 = vpack.c.bf16 %v47_v6, %v46_v4  ;;  %v132_v12 = vld [vmem:[%s611_s4 + $0x10] sm:$0xff]  ;;  %v468_v46 = vmov -1e+10  }
  0x15   :  { %v404_v10 = vpack.c.bf16 %v131_v8, %v130_v7  ;;  %v43_v11 = vld [vmem:[%s607_s0] sm:$0xff]  ;;  %v133_v13 = vld [vmem:[%s611_s4 + $0x18] sm:$0xff]  ;;  %v135_v16 = vld [vmem:[%s611_s4 + $0x28] sm:$0xff] }
  0x16   :  { %399 = vmatpush3.bf16.msra.mxu0 %v398_v5  ;;  %v407_v14 = vpack.c.bf16 %v133_v13, %v132_v12  ;;  %v134_v15 = vld [vmem:[%s611_s4 + $0x20] sm:$0xff]  ;;  %v136_v18 = vld [vmem:[%s611_s4 + $0x30] sm:$0xff]  ;;  %v137_v19 = vld [vmem:[%s611_s4 + $0x38] sm:$0xff] }
  0x17   :  { %400 = vmatprep.subr.bf16.mxu0 %v465_v0  ;;  %405 = vmatpush3.bf16.msra.mxu1 %v404_v10  ;;  %v410_v17 = vpack.c.bf16 %v135_v16, %v134_v15  ;;  %v413_v20 = vpack.c.bf16 %v137_v19, %v136_v18  ;;  %v220_v21 = vld [vmem:[%s613_s6] sm:$0xff]  ;;  %v221_v22 = vld [vmem:[%s613_s6 + $0x8] sm:$0xff]  ;;  %v222_v29 = vld [vmem:[%s613_s6 + $0x10] sm:$0xff] }
  0x18   :  { %406 = vmatprep.subr.bf16.mxu1 %v465_v0  ;;  %v416_v23 = vpack.c.bf16 %v221_v22, %v220_v21  ;;  %v319_v24 = vld [vmem:[%s610_s3] ss:$0 sm:$0xff]  ;;  %v223_v30 = vld [vmem:[%s613_s6 + $0x18] sm:$0xff]  ;;  %v225_v33 = vld [vmem:[%s613_s6 + $0x28] sm:$0xff] }
  0x19   :  { %v419_v31 = vpack.c.bf16 %v223_v30, %v222_v29  ;;  %v224_v32 = vld [vmem:[%s613_s6 + $0x20] sm:$0xff]  ;;  %v226_v35 = vld [vmem:[%s613_s6 + $0x30] sm:$0xff]  ;;  %v227_v36 = vld [vmem:[%s613_s6 + $0x38] sm:$0xff] }
  0x1a   :  { %402 = vmatpush3.bf16.msra.mxu0 %v401_v9  ;;  %v422_v34 = vpack.c.bf16 %v225_v33, %v224_v32  ;;  %v425_v37 = vpack.c.bf16 %v227_v36, %v226_v35  ;;  %v321_v38 = vld [vmem:[%s612_s5] ss:$0 sm:$0xff] }
  0x1b   :  { %415 = vmatprep.subr.bf16.mxu0 %v465_v0  ;;  %408 = vmatpush3.bf16.msra.mxu1 %v407_v14  ;;  %v308_v43 = vld [vmem:[%s608_s1] sm:$0xff] }
  0x1c   :  { %409 = vmatprep.subr.bf16.mxu1 %v465_v0  ;;  %vm309_vm3 = vcmp.gt.f32.partialorder %v308_v43, 0.0  ;;  %v323_v44 = vld [vmem:[%s614_s7] ss:$0 sm:$0xff] }
  0x1d   :  { %357 = vmatmul.mubr.msk.f32.vlgmr.msra.gmra.mrb[0].mxu0 %vm55_vm1, %v43_v11  ;;  %v310_v47 = vsel %vm309_vm3, 0.0, %v468_v46 }
  0x1e   :  { %394 = vmatprep.mubr.msk.f32.mxu0 %vm466_vm0, %v467_v1  ;;  %417 = vmatpush3.bf16.msra.mxu0 %v416_v23 }
  0x1f   :  { %411 = vmatpush3.bf16.msra.mxu1 %v410_v17  ;;  %418 = vmatprep.subr.bf16.mxu0 %v465_v0 }
  0x20   :  { %412 = vmatprep.subr.bf16.mxu1 %v465_v0 }
  0x22   :  { %420 = vmatpush3.bf16.msra.mxu0 %v419_v31 }
  0x23   :  { %414 = vmatpush3.bf16.msra.mxu1 %v413_v20  ;;  %421 = vmatprep.subr.bf16.mxu0 %v465_v0 }
  0x26   :  { %423 = vmatpush3.bf16.msra.mxu0 %v422_v34 }
  0x27   :  { %424 = vmatprep.subr.bf16.mxu0 %v465_v0 }
  0x2a   :  { %426 = vmatpush3.bf16.msra.mxu0 %v425_v37 }
  0xf0   :  { %v125_v25 = vpop.f32.mrb[0].mxu0 }
  0xf1   :  { %v126_v26 = vadd.f32 %v319_v24, %v125_v25  ;;  %v358_v27 = vpop.f32.mrb[1].mxu0 }
  0xf3   :  { %434 = vtanh.f32 %v126_v26 }
  0xfd   :  { %v435_v28 = vpop.eup %434 }
  0xfe   :  { %376 = vmatmul.mubr.msk.f32.vlgmr.msra.gmra.mrb[0].mxu1 %vm145_vm2, %v435_v28 }
 0x1d1   :  { %v215_v39 = vpop.f32.mrb[0].mxu1 }
 0x1d2   :  { %v216_v40 = vadd.f32 %v321_v38, %v215_v39  ;;  %v377_v41 = vpop.f32.mrb[1].mxu1 }
 0x1d4   :  { %436 = vtanh.f32 %v216_v40 }
 0x1de   :  { %v437_v42 = vpop.eup %436 }
 0x1df   :  { %395 = vmatmul.mubr.msk.f32.vlgmr.msra.gmra.mrb[2].mxu0 %vm145_vm2, %v437_v42 }
 0x2b2   :  { %v304_v45 = vpop.f32.mrb[2].mxu0 }
 0x2b3   :  { %v305_v48 = vadd.f32 %v323_v44, %v304_v45  ;;  %v396_v49 = vpop.f32.mrb[3].mxu0 }
 0x2b5   :  { %v311_v50 = vadd.f32 %v310_v47, %v305_v48 }
 0x2b7   :  { %313 = vst.msk [vmem:[%s615_s8] sm:$0xff] %vm312_vm4, %v311_v50 }
 0x2b8   :  { %318 = vsyncpa [#allocation3], 1 }

</bundles_post_ra>
